<compile_context>
chip_gen: v7x
topology: tpu7x:2x2x1
jax: 0.10.0
libtpu: 0.0.40
codegen_flags: <defaults>
</compile_context>

<pallas_src>
import functools

import jax
import jax.numpy as jnp
from jax.experimental import pallas as pl
from jax.experimental.pallas import tpu as pltpu

# Premix weights in the wrapper once the M grid is tall enough that streaming
# both weight matrices per M-block costs more than one extra pass over them.
_PREMIX_MIN_M_BLOCKS = 3


def _round_up(v, m):
    return ((v + m - 1) // m) * m


def _pad2(a, rows, cols, dtype):
    """Cast + zero-pad a 2-D array; no copy if shape/dtype already match."""
    if a.dtype != dtype:
        a = a.astype(dtype)
    if a.shape == (rows, cols):
        return a
    return jnp.zeros((rows, cols), dtype).at[: a.shape[0], : a.shape[1]].set(a)


def _supernet_kernel_premixed(x_ref, w_ref, b_ref, o_ref, acc_ref):
    """Single premixed weight stream: plain tiled matmul + bias + ReLU."""
    k = pl.program_id(2)

    @pl.when(k == 0)
    def _():
        acc_ref[...] = jnp.zeros_like(acc_ref)

    acc_ref[...] += jnp.dot(
        x_ref[...], w_ref[...], preferred_element_type=jnp.float32
    )

    @pl.when(k == pl.num_programs(2) - 1)
    def _():
        out = acc_ref[...] + b_ref[...].astype(jnp.float32)
        o_ref[...] = jnp.maximum(out, 0.0).astype(o_ref.dtype)


def _supernet_kernel_mix(mix_ref, x_ref, w1_ref, w2_ref, b_ref, o_ref, acc_ref):
    """Small-batch path: mix the weight tiles on the VPU, one MXU matmul."""
    k = pl.program_id(2)

    @pl.when(k == 0)
    def _():
        acc_ref[...] = jnp.zeros_like(acc_ref)

    m0 = mix_ref[0]
    m1 = mix_ref[1]
    # Mix in f32 on the VPU (works on v5e too), cast to the MXU compute dtype.
    w_mix = (
        m0 * w1_ref[...].astype(jnp.float32) + m1 * w2_ref[...].astype(jnp.float32)
    ).astype(x_ref.dtype)
    acc_ref[...] += jnp.dot(x_ref[...], w_mix, preferred_element_type=jnp.float32)

    @pl.when(k == pl.num_programs(2) - 1)
    def _():
        out = acc_ref[...] + b_ref[...].astype(jnp.float32)
        o_ref[...] = jnp.maximum(out, 0.0).astype(o_ref.dtype)


@functools.partial(jax.jit, static_argnames=("tm", "tn", "tk", "compute_dtype"))
def supernet_block(
    x,
    arch_weights,
    w1,
    b1,
    w2,
    b2,
    *,
    tm=256,
    tn=1024,
    tk=1024,
    compute_dtype=jnp.bfloat16,
):
    """x: (B, In); w1/w2: (In, Out); b1/b2: (Out,) or (1, Out); arch_weights: (2,)."""
    B, In = x.shape
    Out = w1.shape[1]
    out_dtype = x.dtype

    if compute_dtype is None:
        compute_dtype = jnp.result_type(x.dtype, w1.dtype)
    cdt = jnp.dtype(compute_dtype)
    csize = cdt.itemsize
    # Second-minor tiling granularity: 8 for 32-bit, 16 for 16-bit packing.
    sub = 16 if csize == 2 else 8

    # PyTorch Linear biases are (Out,); accept either layout.
    b1 = jnp.asarray(b1).reshape(1, -1)
    b2 = jnp.asarray(b2).reshape(1, -1)

    # Hoist the 2-element softmax out of the kernel.
    mix = jax.nn.softmax(arch_weights.astype(jnp.float32))

    # Clamp tiles to the (padded) problem; keep lane dims multiples of 128 and
    # second-minor dims multiples of `sub`.  Defaults are 256-aligned for the
    # v6e/v7x 256-wide MXU.
    tm = max(sub, min(tm, _round_up(B, sub)))
    tn = max(128, min(tn, _round_up(Out, 128)))
    tk = max(128, min(tk, _round_up(In, 128)))
    Bp, Inp, Outp = _round_up(B, tm), _round_up(In, tk), _round_up(Out, tn)
    m_blocks, n_blocks, k_blocks = Bp // tm, Outp // tn, Inp // tk
    premix = m_blocks >= _PREMIX_MIN_M_BLOCKS

    # Inputs / biases (bias always premixed; it is added to the f32 accumulator).
    xp = _pad2(x, Bp, Inp, cdt)
    b_mix = mix[0] * b1.astype(jnp.float32) + mix[1] * b2.astype(jnp.float32)
    b_mixp = _pad2(b_mix, 1, Outp, jnp.float32)

    x_spec = pl.BlockSpec((tm, tk), lambda i, j, k: (i, k))
    w_spec = pl.BlockSpec((tk, tn), lambda i, j, k: (k, j))
    b_spec = pl.BlockSpec((1, tn), lambda i, j, k: (0, j))
    out_spec = pl.BlockSpec((tm, tn), lambda i, j, k: (i, j))

    if premix:
        # One streaming pass to mix the weights, then a single weight operand.
        w_mix = mix[0] * w1.astype(jnp.float32) + mix[1] * w2.astype(jnp.float32)
        w_mixp = _pad2(w_mix, Inp, Outp, cdt)
        kernel = _supernet_kernel_premixed
        operands = (xp, w_mixp, b_mixp)
        in_specs = [x_spec, w_spec, b_spec]
        n_w = 1
    else:
        # Small batch: stream both weights once and mix on the VPU in-kernel.
        w1p = _pad2(w1, Inp, Outp, cdt)
        w2p = _pad2(w2, Inp, Outp, cdt)
        kernel = _supernet_kernel_mix
        operands = (mix, xp, w1p, w2p, b_mixp)
        in_specs = [
            pl.BlockSpec(memory_space=pltpu.MemorySpace.SMEM),  # mixing scalars
            x_spec,
            w_spec,
            w_spec,
            b_spec,
        ]
        n_w = 2

    # Double-buffered VMEM footprint (inputs + output) plus the f32 accumulator;
    # request a matching scoped-VMEM limit (capped to stay v7x-friendly).
    out_size = jnp.dtype(out_dtype).itemsize
    footprint = (
        2 * (tm * tk * csize + n_w * tk * tn * csize + tn * 4 + tm * tn * out_size)
        + tm * tn * 4
    )
    vmem_limit = int(min(max(footprint * 3 // 2, 32 * 1024 * 1024), 96 * 1024 * 1024))

    cost = pl.CostEstimate(
        flops=2 * Bp * Inp * Outp,
        transcendentals=0,
        bytes_accessed=(
            Bp * Inp * csize + n_w * Inp * Outp * csize + Outp * 4 + Bp * Outp * out_size
        ),
    )

    out_padded = pl.pallas_call(
        kernel,
        out_shape=jax.ShapeDtypeStruct((Bp, Outp), out_dtype),
        grid_spec=pltpu.PrefetchScalarGridSpec(
            num_scalar_prefetch=0,
            grid=(m_blocks, n_blocks, k_blocks),
            in_specs=in_specs,
            out_specs=out_spec,
            scratch_shapes=[pltpu.VMEM((tm, tn), jnp.float32)],
        ),
        compiler_params=pltpu.CompilerParams(
            dimension_semantics=("parallel", "parallel", "arbitrary"),
            vmem_limit_bytes=vmem_limit,
        ),
        cost_estimate=cost,
    )(*operands)

    if (Bp, Outp) == (B, Out):
        return out_padded
    return out_padded[:B, :Out]


if __name__ == "__main__":
    key = jax.random.PRNGKey(0)
    k_x, k_w1, k_b1, k_w2, k_b2, k_a = jax.random.split(key, 6)

    input_size, output_size = 256, 256

    # Deterministic parameter init (uniform, like PyTorch's default Linear init).
    bound = 1.0 / (input_size ** 0.5)
    w1 = jax.random.uniform(k_w1, (input_size, output_size), jnp.float32, -bound, bound)
    b1 = jax.random.uniform(k_b1, (output_size,), jnp.float32, -bound, bound)
    w2 = jax.random.uniform(k_w2, (input_size, output_size), jnp.float32, -bound, bound)
    b2 = jax.random.uniform(k_b2, (output_size,), jnp.float32, -bound, bound)
    # PyTorch init is ones(2)/2; use random values so the two branches differ.
    arch_weights = jax.random.normal(k_a, (2,), dtype=jnp.float32)

    mix = jax.nn.softmax(arch_weights)

    def reference(x):
        return jnp.maximum(mix[0] * (x @ w1 + b1) + mix[1] * (x @ w2 + b2), 0.0)

    # 1) Small batch -> in-kernel weight-mixing path, f32 compute (exact check),
    #    multi-tile (1, 2, 2) grid with 128-wide tiles.
    x_small = jax.random.normal(k_x, (8, input_size), dtype=jnp.float32)
    out_small = supernet_block(
        x_small, arch_weights, w1, b1, w2, b2, tm=8, tn=128, tk=128,
        compute_dtype=jnp.float32,
    )
    out_small = jax.block_until_ready(out_small)
    ref_small = reference(x_small)
    assert out_small.shape == ref_small.shape
    assert jnp.allclose(out_small, ref_small, atol=1e-5, rtol=1e-5), (
        float(jnp.max(jnp.abs(out_small - ref_small))))

    # 2) Larger batch -> premixed-weight path (>= 3 M-blocks), bf16 MXU operands
    #    with f32 accumulation (default compute dtype); looser tolerance.
    x_big = jax.random.normal(k_x, (64, input_size), dtype=jnp.float32)
    out_big = supernet_block(x_big, arch_weights, w1, b1, w2, b2, tm=16)
    out_big = jax.block_until_ready(out_big)
    ref_big = reference(x_big)
    assert out_big.shape == ref_big.shape
    assert jnp.allclose(out_big, ref_big, atol=3e-2, rtol=3e-2), (
        float(jnp.max(jnp.abs(out_big - ref_big))))

    print("KERNEL_OK")
</pallas_src>

<mosaic_0001>
module attributes {stable_mosaic.version = 11 : i64} {
  func.func @_supernet_kernel_mix(%arg0: i32, %arg1: i32, %arg2: i32, %arg3: memref<2xf32, #tpu.memory_space<smem>>, %arg4: memref<8x128xf32, #tpu.memory_space<vmem>>, %arg5: memref<128x128xf32, #tpu.memory_space<vmem>>, %arg6: memref<128x128xf32, #tpu.memory_space<vmem>>, %arg7: memref<1x128xf32, #tpu.memory_space<vmem>>, %arg8: memref<8x128xf32, #tpu.memory_space<vmem>>, %arg9: memref<8x128xf32, #tpu.memory_space<vmem>>) attributes {dimension_semantics = [#tpu.dimension_semantics<parallel>, #tpu.dimension_semantics<parallel>, #tpu.dimension_semantics<arbitrary>], iteration_bounds = array<i64: 1, 2, 2>, scalar_prefetch = 0 : i64, scratch_operands = 1 : i64, tpu.core_type = #tpu.core_type<tc>, window_params = [{transform_indices = @transform_0, window_bounds = array<i64: 2>}, {transform_indices = @transform_1, window_bounds = array<i64: 8, 128>}, {transform_indices = @transform_2, window_bounds = array<i64: 128, 128>}, {transform_indices = @transform_3, window_bounds = array<i64: 128, 128>}, {transform_indices = @transform_4, window_bounds = array<i64: 1, 128>}, {transform_indices = @transform_5, window_bounds = array<i64: 8, 128>}]} {
    %c0_i32 = arith.constant 0 : i32
    %0 = arith.cmpi eq, %arg2, %c0_i32 : i32
    %1 = arith.extui %0 : i1 to i32
    %c0_i32_0 = arith.constant 0 : i32
    %2 = arith.cmpi ne, %1, %c0_i32_0 : i32
    scf.if %2 {
      %cst_12 = arith.constant 0.000000e+00 : f32
      %20 = vector.broadcast %cst_12 : f32 to vector<8x128xf32>
      %c0_13 = arith.constant 0 : index
      %c0_14 = arith.constant 0 : index
      %21 = vector.load %arg9[%c0_13, %c0_14] : memref<8x128xf32, #tpu.memory_space<vmem>>, vector<8x128xf32>
      tpu.vector_store %arg9[%c0_13, %c0_14], %20 {strides = array<i32>} : memref<8x128xf32, #tpu.memory_space<vmem>>, vector<8x128xf32>,
    } else {
    }
    %c0 = arith.constant 0 : index
    %3 = memref.load %arg3[%c0] : memref<2xf32, #tpu.memory_space<smem>>
    %c1 = arith.constant 1 : index
    %4 = memref.load %arg3[%c1] : memref<2xf32, #tpu.memory_space<smem>>
    %c0_1 = arith.constant 0 : index
    %c0_2 = arith.constant 0 : index
    %5 = vector.load %arg5[%c0_1, %c0_2] : memref<128x128xf32, #tpu.memory_space<vmem>>, vector<128x128xf32>
    %6 = vector.broadcast %3 : f32 to vector<128x128xf32>
    %7 = arith.mulf %6, %5 : vector<128x128xf32>
    %c0_3 = arith.constant 0 : index
    %c0_4 = arith.constant 0 : index
    %8 = vector.load %arg6[%c0_3, %c0_4] : memref<128x128xf32, #tpu.memory_space<vmem>>, vector<128x128xf32>
    %9 = vector.broadcast %4 : f32 to vector<128x128xf32>
    %10 = arith.mulf %9, %8 : vector<128x128xf32>
    %11 = arith.addf %7, %10 : vector<128x128xf32>
    %c0_5 = arith.constant 0 : index
    %c0_6 = arith.constant 0 : index
    %12 = vector.load %arg9[%c0_5, %c0_6] : memref<8x128xf32, #tpu.memory_space<vmem>>, vector<8x128xf32>
    %c0_7 = arith.constant 0 : index
    %c0_8 = arith.constant 0 : index
    %13 = vector.load %arg4[%c0_7, %c0_8] : memref<8x128xf32, #tpu.memory_space<vmem>>, vector<8x128xf32>
    %cst = arith.constant dense<0.000000e+00> : vector<8x128xf32>
    %14 = tpu.matmul %13, %11, %cst {dimension_numbers = #tpu.dot_dimension_numbers<[1], [0], [0], [1], [0, 0, 1, 1], [], []>} : vector<8x128xf32>, vector<128x128xf32>, vector<8x128xf32> -> vector<8x128xf32>
    %15 = arith.addf %12, %14 : vector<8x128xf32>
    %c0_9 = arith.constant 0 : index
    %c0_10 = arith.constant 0 : index
    %16 = vector.load %arg9[%c0_9, %c0_10] : memref<8x128xf32, #tpu.memory_space<vmem>>, vector<8x128xf32>
    tpu.vector_store %arg9[%c0_9, %c0_10], %15 {strides = array<i32>} : memref<8x128xf32, #tpu.memory_space<vmem>>, vector<8x128xf32>,
    %c1_i32 = arith.constant 1 : i32
    %17 = arith.cmpi eq, %arg2, %c1_i32 : i32
    %18 = arith.extui %17 : i1 to i32
    %c0_i32_11 = arith.constant 0 : i32
    %19 = arith.cmpi ne, %18, %c0_i32_11 : i32
    scf.if %19 {
      %c0_12 = arith.constant 0 : index
      %c0_13 = arith.constant 0 : index
      %20 = vector.load %arg9[%c0_12, %c0_13] : memref<8x128xf32, #tpu.memory_space<vmem>>, vector<8x128xf32>
      %c0_14 = arith.constant 0 : index
      %c0_15 = arith.constant 0 : index
      %21 = vector.load %arg7[%c0_14, %c0_15] : memref<1x128xf32, #tpu.memory_space<vmem>>, vector<1x128xf32>
      %22 = vector.broadcast %21 : vector<1x128xf32> to vector<8x128xf32>
      %23 = arith.addf %20, %22 : vector<8x128xf32>
      %cst_16 = arith.constant 0.000000e+00 : f32
      %24 = vector.broadcast %cst_16 : f32 to vector<8x128xf32>
      %25 = arith.maximumf %23, %24 : vector<8x128xf32>
      %c0_17 = arith.constant 0 : index
      %c0_18 = arith.constant 0 : index
      %26 = vector.load %arg8[%c0_17, %c0_18] : memref<8x128xf32, #tpu.memory_space<vmem>>, vector<8x128xf32>
      tpu.vector_store %arg8[%c0_17, %c0_18], %25 {strides = array<i32>} : memref<8x128xf32, #tpu.memory_space<vmem>>, vector<8x128xf32>,
    } else {
    }
    return
  }
  func.func @transform_0(%arg0: i32, %arg1: i32, %arg2: i32) -> i32 {
    %c0_i32 = arith.constant 0 : i32
    %c0_i32_0 = arith.constant 0 : i32
    return %c0_i32 : i32
  }
  func.func @transform_1(%arg0: i32, %arg1: i32, %arg2: i32) -> (i32, i32) {
    %c0_i32 = arith.constant 0 : i32
    return %arg0, %arg2 : i32, i32
  }
  func.func @transform_2(%arg0: i32, %arg1: i32, %arg2: i32) -> (i32, i32) {
    %c0_i32 = arith.constant 0 : i32
    return %arg2, %arg1 : i32, i32
  }
  func.func @transform_3(%arg0: i32, %arg1: i32, %arg2: i32) -> (i32, i32) {
    %c0_i32 = arith.constant 0 : i32
    return %arg2, %arg1 : i32, i32
  }
  func.func @transform_4(%arg0: i32, %arg1: i32, %arg2: i32) -> (i32, i32) {
    %c0_i32 = arith.constant 0 : i32
    %c0_i32_0 = arith.constant 0 : i32
    return %c0_i32, %arg1 : i32, i32
  }
  func.func @transform_5(%arg0: i32, %arg1: i32, %arg2: i32) -> (i32, i32) {
    %c0_i32 = arith.constant 0 : i32
    return %arg0, %arg1 : i32, i32
  }
}

</mosaic_0001>

<bundles_post_ra>
// kernel: supernet_block.1
= control target key start
LH: loop header
LB: loop body
LE: loop exit
PB: predicated region body
PF: predicated region fallthrough
CT: control target
= control target key end

     0   :  { %s1606_s0 = inlined_call_operand.vmem [shape: f32[2], index: 0, kind: input, shape index: {}]   ;;  %s1607_s1 = inlined_call_operand.vmem [shape: f32[8,256], index: 1, kind: input, shape index: {}]   ;;  %s1608_s2 = inlined_call_operand.hbm [shape: f32[256,256], index: 2, kind: input, shape index: {}]   ;;  %s1609_s3 = inlined_call_operand.hbm [shape: f32[256,256], index: 3, kind: input, shape index: {}]   ;;  %s1610_s4 = inlined_call_operand.vmem [shape: f32[1,256], index: 4, kind: input, shape index: {}]   ;;  %s1611_s5 = inlined_call_operand.hbm [shape: f32[8,256], index: 5, kind: output, shape index: {}]  }
   0x1   :  { %1626 = sst [smem:[#allocation24_spill]] %s1606_s0 }
   0x2   :  { %1627 = sst [smem:[#allocation25_spill]] %s1608_s2 }
   0x3   :  { %1628 = sst [smem:[#allocation26_spill]] %s1611_s5 }
   0x4   :  { %10 = vsyncpa [#allocation6], 0 }
   0x5   :  { %11 = vsyncpa [#allocation4], 0 }
   0x6   :  { %13 = vsyncpa [#allocation4 + $0x1], 0 }
   0x7   :  { %14 = vsyncpa [#allocation9], 0 }
   0x8   :  { %16 = vsyncpa [#allocation9 + $0x1], 0 }
   0x9   :  { %17 = vsyncpa [#allocation5], 0 }
   0xa   :  { %19 = vsyncpa [#allocation5 + $0x1], 0  ;;  %s1197_s18 = smov 0   ;;  %s1199_s19 = smov 0  }
   0xb   :  { %s1201_s20 = smov 0   ;;  %s1203_s21 = smov 0  }
   0xc   :  { %s1205_s22 = smov 0   ;;  %s1207_s23 = smov 0  }
   0xd   :  { %s1209_s24 = smov 0   ;;  %s1211_s25 = smov 0  }
   0xe   :  { %s1213_s26 = smov 0   ;;  %s1215_s27 = smov 0  }
   0xf   :  { %s1217_s28 = smov 0  }
  0x10 LB: > { %1629 = sst [smem:[#allocation15_spill]] %s1114_s18  ;;  %s719_s29 = sadd.s32 4294967295, %s1154_s28   ;;  %s1154_s28 = sphi %s1217_s28, %s25_s28   ;;  %s1150_s27 = sphi %s1215_s27, %s1663_s27   ;;  %s1146_s26 = sphi %s1213_s26, %s1669_s26   ;;  %s1142_s25 = sphi %s1211_s25, %s1661_s25   ;;  %s1138_s24 = sphi %s1209_s24, %s1660_s24   ;;  %s1134_s23 = sphi %s1207_s23, %s1659_s23   ;;  %s1130_s22 = sphi %s1205_s22, %s1668_s22   ;;  %s1126_s21 = sphi %s1203_s21, %s1667_s21   ;;  %s1122_s20 = sphi %s1201_s20, %s1666_s20   ;;  %s1118_s19 = sphi %s1199_s19, %s1665_s19   ;;  %s1114_s18 = sphi %s1197_s18, %s1664_s18  }
  0x11   : > { %1630 = sst [smem:[#allocation16_spill]] %s1134_s23  ;;  %s720_s30 = sadd.s32 4294967294, %s1154_s28  }
  0x12   : > { %1631 = sst [smem:[#allocation17_spill]] %s1146_s26  ;;  %p109_p0 = scmp.ne.s32.totalorder %s1134_s23, %s1130_s22 }
  0x13   : > { %1632 = sst [smem:[#allocation18_spill]] %s1150_s27  ;;  %p110_p1 = scmp.eq.s32.totalorder %s1154_s28, 0 }
  0x14   : > { %1633 = sst [smem:[#allocation19_spill]] %s1154_s28  ;;  %p115_p2 = scmp.ne.s32.totalorder %s1130_s22, %s1126_s21 }
  0x15   : > { %p1257_p3 = scmp.eq.s32.totalorder %s719_s29, 0  ;;  %p1262_p4 = por %p110_p1, %p109_p0 }
  0x16   : > { %p194_p5 = scmp.ne.s32.totalorder %s1122_s20, %s1118_s19  ;;  %p195_p7 = scmp.eq.s32.totalorder %s719_s29, 3 }
  0x17   : > { %p1270_p6 = por %p1257_p3, %p115_p2  ;;  %p200_p8 = scmp.ne.s32.totalorder %s1118_s19, %s1114_s18 }
  0x18   : > { %p201_p9 = scmp.eq.s32.totalorder %s720_s30, 3  ;;  %p1276_p10 = por %p195_p7, %p194_p5 }
  0x19   : > { %s1636_s10 = scalar_select %p1270_p6, 1, 0 }
  0x1a   : > { %s1637_s11 = scalar_select %p1276_p10, 1, 0 }
  0x1b   : > { %p721_p11 = scmp.ge.s32.totalorder %s1154_s28, 1  ;;  %p1281_p12 = por %p201_p9, %p200_p8 }
  0x1c   : > { %p208_p13 = scmp.lt.s32.totalorder %s1154_s28, 5  ;;  %s1640_s0 = sld [smem:[#allocation24_spill]] }
  0x1d   : > { %s1638_s12 = scalar_select %p1281_p12, 1, 0 }
  0x1e   : > { %p1289_p0 = pnand %p721_p11, %p208_p13  ;;  %p850_p2 = scmp.lt.s32.totalorder %s1154_s28, 4 }
  0x1f   : > { %1639 = sst [smem:[#allocation20_spill]] %s1638_s12 }
  0x20   : > { %s1641_s16 = scalar_select %p1289_p0, 1, 0 }
  0x21   : > { %p834_p1 = pneg %p1289_p0  ;;  %p1300_p7 = pnand %p850_p2, %p1262_p4 }
  0x22   : > { %s221_s15 = sshll.u32 %s1640_s0, 4  ;;  %s222_s15 = int_to_ptr.vmem [resolvable:$true] %s221_s15 }
  0x23   : > { %p835_p5 = pnand %p834_p1, %p1257_p3  ;;  %s949_s21 = scalar_lea.vmem %s222_s15, 16 }
  0x24   : > { %p950_p8 = scmp.ne.s32.totalorder %s222_s15, %s949_s21  ;;  %p957_p13 = scmp.lt.s32.totalorder %s222_s15, %s222_s15 }
  0x25   : > { %p951_p9 = pneg %p835_p5  ;;  %p958_p10 = scmp.lt.s32.totalorder %s949_s21, %s949_s21 }
  0x27   : > { %p952_p12 = pnand %p951_p9, %p950_p8  ;;  %p959_p6 = por %p958_p10, %p957_p13 }
  0x29   : > { %p953_p11 = pneg %p952_p12 }
  0x2b   : > { %p960_p0 = pnand %p959_p6, %p953_p11 }
  0x2d   : > { %963 = shalt.err (!%p960_p0)
}
  0x2e   : > { %s1156_s29 = smov [#allocation3]   ;;  %s37_s30 = sadd.s32 1, %s1146_s26 }
  0x2f   : > { %837 = dma.vmem_to_smem (!%p835_p5), %s222_s15, 16, %s1156_s29, [#allocation6]  }
  0x30   : > { %s40_s9 = sadd.s32 1, %s1150_s27  ;;  %p38_p4 = scmp.ge.s32.totalorder %s37_s30, 2 }
  0x31   : > { %s1307_s13 = sand.u32 1, %s1134_s23   ;;  %s746_s15 = sshll.u32 %s1146_s26, 5 }
  0x32   : > { %s1618_s14 = sshll.u32 %s1307_s13, 7  ;;  %s1671_s30 = smov (%p38_p4, %s37_s30), 0 }
  0x33   : > { %1643 = sst [smem:[#allocation21_spill]] %s1671_s30  ;;  %s1673_s9 = smov (!%p38_p4, %s40_s9), %s1150_s27 }
  0x34   : > { %s97_s21 = ssub.s32 %s1146_s26, %s1671_s30  ;;  %p42_p6 = scmp.ge.s32.totalorder %s1673_s9, 2 }
  0x35   : > { %s1317_s29 = sadd.s32 %s1150_s27, %s746_s15  ;;  %s247_s6 = scalar_lea.vmem [#allocation7], %s1618_s14 }
  0x36   : > { %s256_s8 = sshll.u32 %s247_s6, 4  ;;  %s1675_s9 = smov (%p42_p6, %s1673_s9), 0  ;;  %s1324_s8 = int_to_ptr.vmem [resolvable:$true] %s256_s8 }
  0x37   : > { %1644 = sst [smem:[#allocation22_spill]] %s1675_s9  ;;  %s727_s0 = sshll.u32 %s1317_s29, 7 }
  0x38   : > { %s98_s12 = ssub.s32 %s1150_s27, %s1675_s9  ;;  %s1645_s2 = sld [smem:[#allocation25_spill]] }
  0x39   : > { %s99_s14 = sor.u32 %s98_s12, %s97_s21  ;;  %p182_p10 = scmp.eq.s32.totalorder %s98_s12, 0 }
  0x3a   : > { %p100_p12 = scmp.eq.s32.totalorder %s99_s14, 0  ;;  %s1646_s6 = sadd.s32 1, %s1122_s20 }
  0x3b   : > { %s1338_s26 = scalar_select %p182_p10, %s1122_s20, %s1646_s6  }
  0x3c   : > { %s1647_s28 = sadd.s32 1, %s1134_s23  ;;  %s244_s9 = scalar_lea.sflag [#allocation4], %s1307_s13 }
  0x3d   : > { %s1343_s5 = scalar_select %p100_p12, %s1134_s23, %s1647_s28  }
  0x3e   : > { %s1333_s15 = scalar_lea.hbm %s1645_s2, %s727_s0  ;;  %p966_p1 = pneg %p1300_p7 }
  0x3f   : > { %1648 = sst [smem:[#allocation23_spill]] %s1343_s5  ;;  %s964_s27 = scalar_lea.hbm %s1333_s15, 2048 }
  0x40   : > { %p965_p0 = scmp.ne.s32.totalorder %s1333_s15, %s964_s27  ;;  %s969_s12 = scalar_lea.hbm %s1645_s2, 8192 }
  0x41   : > { %p970_p8 = scmp.lt.u32.totalorder %s1333_s15, %s1645_s2  ;;  %p971_p9 = scmp.lt.u32.totalorder %s969_s12, %s964_s27 }
  0x42   : > { %p967_p2 = pnand %p966_p1, %p965_p0  ;;  %p973_p13 = scmp.lt.u32.totalorder %s964_s27, %s1333_s15 }
  0x43   : > { %p972_p11 = por %p971_p9, %p970_p8 }
  0x44   : > { %p968_p5 = pneg %p967_p2 }
  0x45   : > { %p974_p4 = por %p973_p13, %p972_p11 }
  0x47   : > { %p975_p6 = pnand %p974_p4, %p968_p5 }
  0x49   : > { %978 = shalt.err (!%p975_p6)
}
  0x4a   : > { %s979_s28 = scalar_lea.vmem %s1324_s8, 2048  ;;  %s1157_s6 = smov [#allocation7]  }
  0x4b   : > { %p980_p10 = scmp.ne.s32.totalorder %s1324_s8, %s979_s28  ;;  %s984_s18 = sshll.u32 %s1157_s6, 4  ;;  %s985_s18 = int_to_ptr.vmem [resolvable:$false] %s984_s18 }
  0x4c   : > { %s986_s30 = scalar_lea.vmem %s985_s18, 4096  ;;  %p987_p2 = scmp.lt.s32.totalorder %s1324_s8, %s985_s18 }
  0x4d   : > { %p982_p12 = pnand %p980_p10, %p966_p1  ;;  %p988_p8 = scmp.lt.s32.totalorder %s986_s30, %s979_s28 }
  0x4f   : > { %p983_p0 = pneg %p982_p12  ;;  %p989_p9 = por %p988_p8, %p987_p2 }
  0x51   : > { %p990_p11 = pnand %p989_p9, %p983_p0 }
  0x53   : > { %993 = shalt.err (!%p990_p11)
}
  0x54   : > { %s1158_s27 = smov 256   ;;  %s1159_s12 = smov 128  }
  0x55   : > { %s1160_s14 = smov 8   ;;  %s1381_s6 = scalar_lea.hbm %s1609_s3, %s727_s0 }
  0x56   : > { %841 = dma.hbm_to_vmem [thread:$0]  (!%p1300_p7), %s1333_s15, 2048, %s1324_s8, %s244_s9, %s1158_s27, %s1159_s12, %s1160_s14  }
  0x57   : > { %s1649_s18 = sshll.u32 %s1307_s13, 7  ;;  %s267_s5 = scalar_lea.sflag [#allocation9], %s1307_s13 }
  0x58   : > { %s270_s30 = scalar_lea.vmem [#allocation8], %s1649_s18  ;;  %s994_s23 = scalar_lea.hbm %s1381_s6, 2048 }
  0x59   : > { %s279_s2 = sshll.u32 %s270_s30, 4  ;;  %p995_p5 = scmp.ne.s32.totalorder %s1381_s6, %s994_s23  ;;  %s1385_s2 = int_to_ptr.vmem [resolvable:$true] %s279_s2 }
  0x5a   : > { %s999_s0 = scalar_lea.hbm %s1609_s3, 8192  ;;  %p1000_p6 = scmp.lt.u32.totalorder %s1381_s6, %s1609_s3 }
  0x5b   : > { %p997_p13 = pnand %p995_p5, %p966_p1  ;;  %p1001_p10 = scmp.lt.u32.totalorder %s999_s0, %s994_s23 }
  0x5c   : > { %p1003_p0 = scmp.lt.u32.totalorder %s994_s23, %s1381_s6 }
  0x5d   : > { %p998_p4 = pneg %p997_p13  ;;  %p1002_p12 = por %p1001_p10, %p1000_p6 }
  0x5f   : > { %p1004_p2 = por %p1003_p0, %p1002_p12 }
  0x61   : > { %p1005_p8 = pnand %p1004_p2, %p998_p4 }
  0x63   : > { %1008 = shalt.err (!%p1005_p8)
}
  0x64   : > { %s1009_s21 = scalar_lea.vmem %s1385_s2, 2048  ;;  %s1161_s28 = smov [#allocation8]  }
  0x65   : > { %p1010_p9 = scmp.ne.s32.totalorder %s1385_s2, %s1009_s21  ;;  %s1014_s18 = sshll.u32 %s1161_s28, 4  ;;  %s1015_s18 = int_to_ptr.vmem [resolvable:$false] %s1014_s18 }
  0x66   : > { %s1016_s30 = scalar_lea.vmem %s1015_s18, 4096  ;;  %p1017_p13 = scmp.lt.s32.totalorder %s1385_s2, %s1015_s18 }
  0x67   : > { %p1012_p11 = pnand %p1010_p9, %p966_p1  ;;  %p1018_p6 = scmp.lt.s32.totalorder %s1016_s30, %s1009_s21 }
  0x69   : > { %p1013_p5 = pneg %p1012_p11  ;;  %p1019_p10 = por %p1018_p6, %p1017_p13 }
  0x6b   : > { %p1020_p12 = pnand %p1019_p10, %p1013_p5 }
  0x6d   : > { %1023 = shalt.err (!%p1020_p12)
}
  0x6e   : > { %844 = dma.hbm_to_vmem [thread:$0]  (!%p1300_p7), %s1381_s6, 2048, %s1385_s2, %s267_s5, %s1158_s27, %s1159_s12, %s1160_s14  }
  0x6f   : > { %p1650_p1 = scmp.ne.s32.totalorder %s1641_s16, 0 }
  0x71   : > { %297 = sbr.rel (%p1650_p1) target bundleno = 441 (0x1b9), region = 40 }
  0x78   : > { %1097 = dma.done.wait (%p1257_p3), [#allocation6], 16  }
  0x79   : > { %1099 = vsyncadd (%p1257_p3), [#allocation6], 4294967280  ;;  %s303_s23 = sand.u32 1, %s1130_s22   ;;  %p1651_p4 = scmp.ne.s32.totalorder %s1636_s10, 0 }
  0x7a   : > { %s734_s17 = sshll.u32 %s303_s23, 7  ;;  %s304_s8 = scalar_lea.sflag [#allocation4], %s303_s23 }
  0x7b   : > { %s1423_s9 = scalar_lea.vmem [#allocation7], %s734_s17 }
  0x7c   : > { %1101 = dma.done.wait (%p1651_p4), %s304_s8, 2048  }
  0x7d   : > { %1103 = vsyncadd (%p1651_p4), %s304_s8, 4294965248  ;;  %s313_s2 = scalar_lea.sflag [#allocation9], %s303_s23  ;;  %s1429_s5 = scalar_lea.vmem [#allocation8], %s734_s17 }
  0x7e   : > { %1105 = dma.done.wait (%p1651_p4), %s313_s2, 2048  }
  0x7f   : > { %1107 = vsyncadd (%p1651_p4), %s313_s2, 4294965248 }
  0x80   : > { %321 = sfence }
  0x81   : > { %s357_s7 = sand.u32 1, %s1118_s19   ;;  %p362_p3 = scmp.lt.s32.totalorder %s1138_s24, 1 }
  0x82   : > { %s1439_s16 = sshll.u32 %s357_s7, 3  ;;  %p370_p7 = scmp.lt.s32.totalorder %s1142_s25, 1 }
  0x83   : > { %s363_s13 = scalar_select %p362_p3, %s1138_s24, 1 }
  0x84   : > { %s1444_s27 = scalar_select %p370_p7, %s1142_s25, 1 }
  0x85   : > { %s737_s10 = sshll.u32 %s363_s13, 3  ;;  %s359_s21 = scalar_lea.vmem [#allocation10], %s1439_s16 }
  0x86   : > { %s1449_s6 = scalar_lea.vmem %s1607_s1, %s737_s10  ;;  %s372_s15 = scalar_lea.vmem %s1610_s4, %s1444_s27 }
  0x87   : > { %p738_p0 = scmp.ne.s32.totalorder %s1138_s24, 0 }
  0x88   : > { %v1162_v0 = vmov (!%p738_p0), 0.0  }
  0x89   : > { %376 = sbr.rel (%p738_p0) target bundleno = 144 (0x90), region = 56  ;;  %377 = vst [vmem:[#allocation2] sm:$0xff] (!%p738_p0), %v1162_v0 }
  0x90 PF: > { %s378_s28 = sld [smem:[#allocation3]]  ;;  %s739_s18 = sld [smem:[#allocation3 + $0x1]]  ;;  %v1163_v1 = vmov 0.0|0.0   ;;  %vm1164_vm0 = vmmov 0   ;;  %v1165_v2 = vmov 0.0   ;;  %v380_v3 = vld [vmem:[%s1423_s9] sm:$0xff] }
  0x91   : > { %800 = vmatprep.subr.bf16.mxu0 %v1163_v1  ;;  %797 = vmatprep.mubr.msk.f32.mxu0 %vm1164_vm0, %v1165_v2  ;;  %v381_v4 = vld [vmem:[%s1423_s9 + $0x8] sm:$0xff]  ;;  %v413_v5 = vld [vmem:[%s1429_s5] sm:$0xff]  ;;  %v382_v7 = vld [vmem:[%s1423_s9 + $0x10] sm:$0xff]  ;;  %p740_p2 = scmp.ne.s32.totalorder %s1138_s24, 1 }
  0x92   : > { %v414_v6 = vld [vmem:[%s1429_s5 + $0x8] sm:$0xff]  ;;  %v383_v8 = vld [vmem:[%s1423_s9 + $0x18] sm:$0xff]  ;;  %v415_v9 = vld [vmem:[%s1429_s5 + $0x10] sm:$0xff] }
  0x93   : > { %v416_v10 = vld [vmem:[%s1429_s5 + $0x18] sm:$0xff]  ;;  %v384_v13 = vld [vmem:[%s1423_s9 + $0x20] sm:$0xff]  ;;  %v385_v14 = vld [vmem:[%s1423_s9 + $0x28] sm:$0xff] }
  0x94   : > { %v417_v19 = vld [vmem:[%s1429_s5 + $0x20] sm:$0xff]  ;;  %v418_v20 = vld [vmem:[%s1429_s5 + $0x28] sm:$0xff]  ;;  %v386_v29 = vld [vmem:[%s1423_s9 + $0x30] sm:$0xff] }
  0x95   : > { %v387_v30 = vld [vmem:[%s1423_s9 + $0x38] sm:$0xff]  ;;  %v419_v31 = vld [vmem:[%s1429_s5 + $0x30] sm:$0xff]  ;;  %v388_v45 = vld [vmem:[%s1423_s9 + $0x40] sm:$0xff] }
  0x96   : > { %v1466_v11 = vstv %s378_s28  ;;  %v1468_v12 = vstv %s739_s18  ;;  %v420_v36 = vld [vmem:[%s1429_s5 + $0x38] sm:$0xff]  ;;  %v421_v46 = vld [vmem:[%s1429_s5 + $0x40] sm:$0xff] }
  0x97   : > { %v397_v15 = vmul.f32 %v1466_v11, %v380_v3  ;;  %v398_v16 = vmul.f32 %v1466_v11, %v381_v4  ;;  %v430_v17 = vmul.f32 %v1468_v12, %v413_v5  ;;  %v431_v18 = vmul.f32 %v1468_v12, %v414_v6  ;;  %v389_v47 = vld [vmem:[%s1423_s9 + $0x48] sm:$0xff]  ;;  %v390_v56 = vld [vmem:[%s1423_s9 + $0x50] sm:$0xff]  ;;  %v391_v58 = vld [vmem:[%s1423_s9 + $0x58] sm:$0xff] }
  0x98   : > { %v399_v21 = vmul.f32 %v1466_v11, %v382_v7  ;;  %v400_v22 = vmul.f32 %v1466_v11, %v383_v8  ;;  %v432_v23 = vmul.f32 %v1468_v12, %v415_v9  ;;  %v433_v24 = vmul.f32 %v1468_v12, %v416_v10  ;;  %v422_v48 = vld [vmem:[%s1429_s5 + $0x48] sm:$0xff]  ;;  %v423_v57 = vld [vmem:[%s1429_s5 + $0x50] sm:$0xff]  ;;  %v424_v59 = vld [vmem:[%s1429_s5 + $0x58] sm:$0xff] }
  0x99   : > { %v446_v25 = vadd.f32 %v430_v17, %v397_v15  ;;  %v447_v26 = vadd.f32 %v431_v18, %v398_v16  ;;  %v401_v27 = vmul.f32 %v1466_v11, %v384_v13  ;;  %v402_v28 = vmul.f32 %v1466_v11, %v385_v14  ;;  %v392_v4 = vld [vmem:[%s1423_s9 + $0x60] sm:$0xff]  ;;  %v393_v5 = vld [vmem:[%s1423_s9 + $0x68] sm:$0xff]  ;;  %v394_v17 = vld [vmem:[%s1423_s9 + $0x70] sm:$0xff] }
  0x9a   : > { %v448_v32 = vadd.f32 %v432_v23, %v399_v21  ;;  %v449_v33 = vadd.f32 %v433_v24, %v400_v22  ;;  %v434_v34 = vmul.f32 %v1468_v12, %v417_v19  ;;  %v435_v35 = vmul.f32 %v1468_v12, %v418_v20  ;;  %v425_v6 = vld [vmem:[%s1429_s5 + $0x60] sm:$0xff]  ;;  %v426_v7 = vld [vmem:[%s1429_s5 + $0x68] sm:$0xff]  ;;  %v395_v18 = vld [vmem:[%s1423_s9 + $0x78] sm:$0xff] }
  0x9b   : > { %v801_v37 = vpack.c.bf16 %v447_v26, %v446_v25  ;;  %v403_v38 = vmul.f32 %v1466_v11, %v386_v29  ;;  %v404_v39 = vmul.f32 %v1466_v11, %v387_v30  ;;  %v436_v40 = vmul.f32 %v1468_v12, %v419_v31  ;;  %v427_v19 = vld [vmem:[%s1429_s5 + $0x70] sm:$0xff]  ;;  %v428_v20 = vld [vmem:[%s1429_s5 + $0x78] sm:$0xff] }
  0x9c   : > { %v804_v41 = vpack.c.bf16 %v449_v33, %v448_v32  ;;  %v450_v42 = vadd.f32 %v434_v34, %v401_v27  ;;  %v451_v43 = vadd.f32 %v435_v35, %v402_v28  ;;  %v437_v44 = vmul.f32 %v1468_v12, %v420_v36  ;;  %v462_v32 = vld [vmem:[#allocation2] sm:$0xff] }
  0x9d   : > { %802 = vmatpush3.bf16.msra.mxu0 %v801_v37  ;;  %v452_v49 = vadd.f32 %v436_v40, %v403_v38  ;;  %v405_v50 = vmul.f32 %v1466_v11, %v388_v45  ;;  %v438_v51 = vmul.f32 %v1468_v12, %v421_v46  ;;  %v406_v54 = vmul.f32 %v1466_v11, %v389_v47  ;;  %v741_v36 = vld [vmem:[%s372_s15] ss:$0 sm:$0xff] (!%p740_p2) }
  0x9e   : > { %803 = vmatprep.subr.bf16.mxu0 %v1163_v1  ;;  %v807_v52 = vpack.c.bf16 %v451_v43, %v450_v42  ;;  %v453_v53 = vadd.f32 %v437_v44, %v404_v39  ;;  %v439_v55 = vmul.f32 %v1468_v12, %v422_v48  ;;  %v407_v61 = vmul.f32 %v1466_v11, %v390_v56 }
  0x9f   : > { %v454_v60 = vadd.f32 %v438_v51, %v405_v50  ;;  %v440_v62 = vmul.f32 %v1468_v12, %v423_v57  ;;  %v408_v2 = vmul.f32 %v1466_v11, %v391_v58  ;;  %v441_v3 = vmul.f32 %v1468_v12, %v424_v59 }
  0xa0   : > { %v810_v63 = vpack.c.bf16 %v453_v53, %v452_v49  ;;  %v455_v0 = vadd.f32 %v439_v55, %v406_v54  ;;  %v409_v9 = vmul.f32 %v1466_v11, %v392_v4  ;;  %v410_v10 = vmul.f32 %v1466_v11, %v393_v5 }
  0xa1   : > { %805 = vmatpush3.bf16.msra.mxu0 %v804_v41  ;;  %v456_v8 = vadd.f32 %v440_v62, %v407_v61  ;;  %v457_v14 = vadd.f32 %v441_v3, %v408_v2  ;;  %v442_v15 = vmul.f32 %v1468_v12, %v425_v6  ;;  %v443_v16 = vmul.f32 %v1468_v12, %v426_v7 }
  0xa2   : > { %806 = vmatprep.subr.bf16.mxu0 %v1163_v1  ;;  %v813_v13 = vpack.c.bf16 %v455_v0, %v454_v60  ;;  %v411_v21 = vmul.f32 %v1466_v11, %v394_v17  ;;  %v412_v22 = vmul.f32 %v1466_v11, %v395_v18  ;;  %v444_v23 = vmul.f32 %v1468_v12, %v427_v19  ;;  %v463_v11 = vld [vmem:[%s1449_s6] sm:$0xff] }
  0xa3   : > { %v816_v24 = vpack.c.bf16 %v457_v14, %v456_v8  ;;  %v458_v25 = vadd.f32 %v442_v15, %v409_v9  ;;  %v459_v26 = vadd.f32 %v443_v16, %v410_v10  ;;  %v445_v27 = vmul.f32 %v1468_v12, %v428_v20 }
  0xa4   : > { %v460_v29 = vadd.f32 %v444_v23, %v411_v21 }
  0xa5   : > { %808 = vmatpush3.bf16.msra.mxu0 %v807_v52  ;;  %v819_v28 = vpack.c.bf16 %v459_v26, %v458_v25  ;;  %v461_v30 = vadd.f32 %v445_v27, %v412_v22 }
  0xa6   : > { %809 = vmatprep.subr.bf16.mxu0 %v1163_v1 }
  0xa7   : > { %v822_v31 = vpack.c.bf16 %v461_v30, %v460_v29 }
  0xa9   : > { %811 = vmatpush3.bf16.msra.mxu0 %v810_v63 }
  0xaa   : > { %812 = vmatprep.subr.bf16.mxu0 %v1163_v1 }
  0xad   : > { %814 = vmatpush3.bf16.msra.mxu0 %v813_v13 }
  0xae   : > { %815 = vmatprep.subr.bf16.mxu0 %v1163_v1 }
  0xb1   : > { %817 = vmatpush3.bf16.msra.mxu0 %v816_v24 }
  0xb2   : > { %818 = vmatprep.subr.bf16.mxu0 %v1163_v1 }
  0xb5   : > { %820 = vmatpush3.bf16.msra.mxu0 %v819_v28 }
  0xb6   : > { %821 = vmatprep.subr.bf16.mxu0 %v1163_v1 }
  0xb9   : > { %823 = vmatpush3.bf16.msra.mxu0 %v822_v31 }
  0xbc   : > { %798 = vmatmul.mubr.f32.vlgmr.msra.gmra.mrb[0].mxu0 %v463_v11 }
 0x18c   : > { %539 = sbr.rel (%p740_p2) target bundleno = 415 (0x19f), region = 60 }
 0x18f   : > { %v530_v33 = vpop.f32.mrb[0].mxu0 }
 0x190   : > { %v534_v34 = vadd.f32 %v530_v33, %v462_v32  ;;  %v799_v35 = vpop.f32.mrb[1].mxu0 }
 0x192   : > { %535 = vst [vmem:[#allocation2] sm:$0xff] %v534_v34 }
 0x199   : > { %v540_v12 = vld [vmem:[#allocation2] sm:$0xff] }
 0x19a   : > { %v548_v1 = vadd.f32 %v741_v36, %v540_v12 }
 0x19c   : > { %v549_v37 = vmax.f32 %v548_v1, 0.0 }
 0x19e   : > { %550 = vst [vmem:[%s359_s21] sm:$0xff] %v549_v37 }
 0x19f PF: > { %s743_s17 = sshll.u32 %s1142_s25, 7  ;;  %s1652_s9 = sld [smem:[#allocation26_spill]] }
 0x1a0   : > { %s567_s5 = sshll.u32 %s359_s21, 4  ;;  %s552_s13 = scalar_lea.sflag [#allocation5], %s357_s7  ;;  %s568_s5 = int_to_ptr.vmem [resolvable:$true] %s567_s5 }
 0x1a1   : > { %s1024_s27 = scalar_lea.vmem %s568_s5, 128  ;;  %p1653_p9 = scmp.ne.s32.totalorder %s1637_s11, 0 }
 0x1a2   : > { %p1025_p8 = scmp.ne.s32.totalorder %s568_s5, %s1024_s27  ;;  %s1166_s10 = smov [#allocation10]  }
 0x1a3   : > { %s1028_s12 = sshll.u32 %s1166_s10, 4  ;;  %s1029_s12 = int_to_ptr.vmem [resolvable:$false] %s1028_s12 }
 0x1a4   : > { %p1026_p11 = pnand %p1025_p8, %p1653_p9  ;;  %s1030_s14 = scalar_lea.vmem %s1029_s12, 256 }
 0x1a5   : > { %s1546_s2 = scalar_lea.hbm %s1652_s9, %s743_s17  ;;  %p1031_p13 = scmp.lt.s32.totalorder %s568_s5, %s1029_s12 }
 0x1a6   : > { %p1027_p5 = pneg %p1026_p11  ;;  %p1032_p6 = scmp.lt.s32.totalorder %s1030_s14, %s1024_s27 }
 0x1a8   : > { %p1033_p10 = por %p1032_p6, %p1031_p13 }
 0x1aa   : > { %p1034_p12 = pnand %p1033_p10, %p1027_p5 }
 0x1ac   : > { %1037 = shalt.err (!%p1034_p12)
}
 0x1ad   : > { %s1038_s25 = scalar_lea.hbm %s1546_s2, 128  ;;  %s1042_s6 = scalar_lea.hbm %s1652_s9, 256 }
 0x1ae   : > { %p1039_p1 = scmp.ne.s32.totalorder %s1546_s2, %s1038_s25  ;;  %p1043_p7 = scmp.lt.u32.totalorder %s1546_s2, %s1652_s9 }
 0x1af   : > { %p1044_p0 = scmp.lt.u32.totalorder %s1042_s6, %s1038_s25  ;;  %p1046_p8 = scmp.lt.u32.totalorder %s1038_s25, %s1546_s2 }
 0x1b0   : > { %p1040_p4 = pnand %p1039_p1, %p1653_p9 }
 0x1b1   : > { %p1045_p2 = por %p1044_p0, %p1043_p7 }
 0x1b2   : > { %p1041_p3 = pneg %p1040_p4 }
 0x1b3   : > { %p1047_p11 = por %p1046_p8, %p1045_p2 }
 0x1b5   : > { %p1048_p5 = pnand %p1047_p11, %p1041_p3 }
 0x1b7   : > { %1051 = shalt.err (!%p1048_p5)
}
 0x1b8   : > { %832 = dma.vmem_to_hbm [thread:$0]  (%p1653_p9), %s568_s5, 128, %s1546_s2, %s552_s13  }
 0x1b9 PF: > { %s1654_s15 = sld [smem:[#allocation19_spill]]  ;;  %s1655_s21 = sld [smem:[#allocation15_spill]] }
 0x1ba   : > { %s1656_s28 = sld [smem:[#allocation20_spill]] }
 0x1bf   : > { %p852_p13 = scmp.ge.s32.totalorder %s1654_s15, 2  ;;  %s579_s18 = sand.u32 1, %s1655_s21  }
 0x1c0   : > { %p1657_p6 = scmp.ne.s32.totalorder %s1656_s28, 0  ;;  %s580_s30 = scalar_lea.sflag [#allocation5], %s579_s18 }
 0x1c2   : > { %p846_p10 = pnand %p852_p13, %p1657_p6 }
 0x1c4   : > { %1109 = dma.done.wait (!%p846_p10), %s580_s30, 128  }
 0x1c5   : > { %1111 = vsyncadd (!%p846_p10), %s580_s30, 4294967168  ;;  %s25_s28 = sadd.s32 1, %s1654_s15   ;;  %s1658_s11 = sld [smem:[#allocation16_spill]] }
 0x1c6   : > { %p22_p12 = scmp.ge.s32.totalorder %s25_s28, 6   ;;  %s1659_s23 = sld [smem:[#allocation23_spill]] }
 0x1c7   : > { %s1660_s24 = sld [smem:[#allocation17_spill]]  ;;  %s1661_s25 = sld [smem:[#allocation18_spill]] }
 0x1c8   : > { %s1662_s17 = sld [smem:[#allocation21_spill]]  ;;  %s1663_s27 = sld [smem:[#allocation22_spill]] }
 0x1c9   : > { %s1664_s18 = smov %s1118_s19  ;;  %s1665_s19 = smov %s1122_s20 }
 0x1ca   : > { %s1666_s20 = smov %s1338_s26  ;;  %s1667_s21 = smov %s1130_s22 }
 0x1cb   : > { %s1668_s22 = smov %s1658_s11  ;;  %24 = sbr.rel (!%p22_p12) target bundleno = 16 (0x10), region = 117 }
 0x1ce   : > { %s1669_s26 = smov %s1662_s17 }
 0x1d2   :  { %585 = vsyncpa [#allocation4], 1 }
 0x1d3   :  { %587 = vsyncpa [#allocation4 + $0x1], 1 }
 0x1d4   :  { %588 = vsyncpa [#allocation9], 1 }
 0x1d5   :  { %590 = vsyncpa [#allocation9 + $0x1], 1 }
 0x1d6   :  { %591 = vsyncpa [#allocation5], 1 }
 0x1d7   :  { %593 = vsyncpa [#allocation5 + $0x1], 1 }
 0x1d8   :  { %594 = vsyncpa [#allocation6], 1 }
 0x1d9   :  { %596 = vsyncpa [#allocation6 + $0x1], 1 }

</bundles_post_ra>
